<compile_context>
chip_gen: v5e
topology: v5e:2x2
jax: 0.10.0
libtpu: 0.0.40
codegen_flags: <defaults>
</compile_context>

<pallas_src>
import functools
import math

import jax
import jax.numpy as jnp
from jax import lax
from jax.experimental import pallas as pl
from jax.experimental.pallas import tpu as pltpu

_NEG_FILL = -1.0e9
_LN_EPS = 1e-5


def _vmem_limit_bytes():
    """Scoped-VMEM allowance: generous, but re-derived on small-VMEM chips."""
    try:
        cap = int(pltpu.get_tpu_info().vmem_capacity_bytes)
        return int(min(96 * 2 ** 20, (cap * 3) // 4))
    except Exception:
        return 64 * 2 ** 20


_VMEM_LIMIT = _vmem_limit_bytes()


def _probe_buffered():
    """Feature-test BlockSpec(pipeline_mode=pl.Buffered(1)) on this JAX/TPU."""
    if not hasattr(pl, "Buffered"):
        return False
    try:
        def _copy(x_ref, o_ref):
            o_ref[...] = x_ref[...]

        x = jnp.arange(16 * 128, dtype=jnp.float32).reshape(16, 128)
        out = pl.pallas_call(
            _copy,
            out_shape=jax.ShapeDtypeStruct((16, 128), jnp.float32),
            grid=(2,),
            in_specs=[pl.BlockSpec((8, 128), lambda i: (i, 0),
                                   pipeline_mode=pl.Buffered(1))],
            out_specs=pl.BlockSpec((8, 128), lambda i: (i, 0)),
        )(x)
        jax.block_until_ready(out)
        return bool(jnp.allclose(out, x))
    except Exception:
        return False


_BUFFERED_OK = _probe_buffered()


def _spec(block_shape, index_map, *, buffers=None):
    """BlockSpec; optionally single-buffered (VMEM saver for grid-invariant
    weights — matters most on v7x's 64 MiB VMEM) when supported."""
    if buffers is not None and _BUFFERED_OK:
        return pl.BlockSpec(block_shape, index_map,
                            pipeline_mode=pl.Buffered(buffers))
    return pl.BlockSpec(block_shape, index_map)


def _pick_tile(dim, target, align):
    """Largest `align`-aligned divisor of dim that is <= target, else dim."""
    if dim <= target:
        return dim
    t = (target // align) * align
    while t >= align:
        if dim % t == 0:
            return t
        t -= align
    return dim


def _layernorm(z, g, b):
    mu = jnp.mean(z, axis=-1, keepdims=True)
    var = jnp.mean(jnp.square(z - mu), axis=-1, keepdims=True)
    return (z - mu) * lax.rsqrt(var + _LN_EPS) * g + b


# ---------------------------------------------------------------------------
# Kernels
# ---------------------------------------------------------------------------
def _matmul_bias_kernel(x_ref, w_ref, b_ref, o_ref, acc_ref):
    """Grouped tiled y[g] = x @ w[g] + b[g]; f32 accumulator, K last grid axis."""
    @pl.when(pl.program_id(3) == 0)
    def _():
        acc_ref[...] = jnp.zeros_like(acc_ref)

    acc_ref[...] += jnp.dot(x_ref[...], w_ref[0],
                            preferred_element_type=jnp.float32)

    @pl.when(pl.program_id(3) == pl.num_programs(3) - 1)
    def _():
        o_ref[0] = (acc_ref[...] + b_ref[0]).astype(o_ref.dtype)


def _proj_res_ln_kernel(a_ref, wt_ref, b_ref, res_ref, g_ref, beta_ref,
                        o_ref, obf_ref, *, alpha):
    """out = LayerNorm(res*alpha + (a @ wt + b)); emits f32 + bf16 copies."""
    y = jnp.dot(a_ref[...], wt_ref[...],
                preferred_element_type=jnp.float32) + b_ref[...]
    z = res_ref[...] * alpha + y
    out = _layernorm(z, g_ref[...], beta_ref[...])
    o_ref[...] = out
    obf_ref[...] = out.astype(jnp.bfloat16)


def _ffn_res_ln_kernel(x_ref, w1t_ref, b1_ref, w2t_ref, b2_ref, g_ref,
                       beta_ref, o_ref, obf_ref, *, alpha):
    """out = LayerNorm(x*alpha + FFN(x)); FFN = relu(x@w1+b1)@w2+b2."""
    x = x_ref[...]
    h = jnp.dot(x.astype(jnp.bfloat16), w1t_ref[...],
                preferred_element_type=jnp.float32) + b1_ref[...]
    h = jnp.maximum(h, 0.0).astype(jnp.bfloat16)
    y = jnp.dot(h, w2t_ref[...], preferred_element_type=jnp.float32) + b2_ref[...]
    z = x * alpha + y
    out = _layernorm(z, g_ref[...], beta_ref[...])
    o_ref[...] = out
    obf_ref[...] = out.astype(jnp.bfloat16)


def _attn_kernel(q_ref, k_ref, v_ref, pad_ref, o_ref, *, n_head, scale, causal):
    """All heads of one (batch, q-tile).  Per-head (Lk, dk) slabs are sliced
    from the refs (never the whole K/V block as values), only one (tq, Lk)
    f32 score is live at a time, and each head's result is stored directly
    into its output lanes (no concatenate, no (H, tq, dk) live array)."""
    tq = q_ref.shape[2]
    d_model = q_ref.shape[3]
    lk = k_ref.shape[2]
    dk = d_model // n_head

    pad_row = pad_ref[0] != 0                                    # (1, Lk)
    if causal:
        row = lax.broadcasted_iota(jnp.int32, (tq, lk), 0) + pl.program_id(1) * tq
        col = lax.broadcasted_iota(jnp.int32, (tq, lk), 1)
        masked = pad_row | (col > row)                           # (tq, Lk)
    else:
        masked = pad_row                                         # (1, Lk)

    for h in range(n_head):
        lo, hi = h * dk, (h + 1) * dk
        q_h = q_ref[0, 0, :, lo:hi] * scale   # fold 1/sqrt(dk) into q (bf16)
        k_h = k_ref[0, 0, :, lo:hi]           # (Lk, dk), ref-sliced load
        v_h = v_ref[0, 0, :, lo:hi]           # (Lk, dk), ref-sliced load
        s = lax.dot_general(q_h, k_h, (((1,), (1,)), ((), ())),
                            preferred_element_type=jnp.float32)  # (tq, Lk)
        s = jnp.where(masked, _NEG_FILL, s)
        s = s - jnp.max(s, axis=-1, keepdims=True)
        e = jnp.exp(s)                                           # f32 softmax
        inv = pl.reciprocal(jnp.sum(e, axis=-1, keepdims=True), approx=True)
        p = (e * inv).astype(jnp.bfloat16)
        o_h = jnp.dot(p, v_h, preferred_element_type=jnp.float32)
        o_ref[0, :, lo:hi] = o_h.astype(o_ref.dtype)   # direct per-head store


# ---------------------------------------------------------------------------
# pallas_call wrappers
# ---------------------------------------------------------------------------
def grouped_matmul_bias(x, w, b, out_dtype=jnp.bfloat16, tm=256, tn=512, tk=512):
    """y[g] = x @ w[g] + b[g].  x: (M,K) bf16, w: (G,K,N) bf16, b: (G,1,N) f32.
    Returns (G, M, N) so Q/K/V (and K/V) come out pre-split — no wrapper-side
    slice copies between pallas_calls."""
    M, K = x.shape
    G, _, N = w.shape
    tm = _pick_tile(M, tm, 16)           # bf16 rows: align to 16 sublane-pairs
    tn = _pick_tile(N, tn, 128)
    tk = _pick_tile(K, tk, 128)
    grid = (M // tm, G, N // tn, K // tk)
    flops = 2 * M * K * N * G
    bytes_accessed = int(x.size * x.dtype.itemsize + w.size * 2 + b.size * 4
                         + G * M * N * jnp.dtype(out_dtype).itemsize)
    return pl.pallas_call(
        _matmul_bias_kernel,
        out_shape=jax.ShapeDtypeStruct((G, M, N), out_dtype),
        grid=grid,
        in_specs=[
            pl.BlockSpec((tm, tk), lambda i, g, j, k: (i, k)),
            pl.BlockSpec((1, tk, tn), lambda i, g, j, k: (g, k, j)),
            pl.BlockSpec((1, 1, tn), lambda i, g, j, k: (g, 0, j)),
        ],
        out_specs=pl.BlockSpec((1, tm, tn), lambda i, g, j, k: (g, i, j)),
        scratch_shapes=[pltpu.VMEM((tm, tn), jnp.float32)],
        compiler_params=pltpu.CompilerParams(
            dimension_semantics=("parallel", "parallel", "parallel", "arbitrary"),
            vmem_limit_bytes=_VMEM_LIMIT),
        cost_estimate=pl.CostEstimate(flops=int(flops), transcendentals=0,
                                      bytes_accessed=bytes_accessed),
    )(x, w, b)


def proj_residual_layernorm(a, wt, b, res, g, beta, alpha, tm=256):
    """(f32, bf16) = LayerNorm(res*alpha + a @ wt + b).  a bf16, res f32."""
    M, K = a.shape
    N = wt.shape[1]
    tm = _pick_tile(M, tm, 16)
    flops = 2 * M * K * N
    bytes_accessed = int(a.size * 2 + wt.size * 2 + (1 + 2) * N * 4
                         + res.size * 4 + M * N * (4 + 2))
    return pl.pallas_call(
        functools.partial(_proj_res_ln_kernel, alpha=alpha),
        out_shape=(jax.ShapeDtypeStruct((M, N), jnp.float32),
                   jax.ShapeDtypeStruct((M, N), jnp.bfloat16)),
        grid=(M // tm,),
        in_specs=[
            pl.BlockSpec((tm, K), lambda i: (i, 0)),
            _spec((K, N), lambda i: (0, 0), buffers=1),     # grid-invariant
            _spec((1, N), lambda i: (0, 0), buffers=1),
            pl.BlockSpec((tm, N), lambda i: (i, 0)),
            _spec((1, N), lambda i: (0, 0), buffers=1),
            _spec((1, N), lambda i: (0, 0), buffers=1),
        ],
        out_specs=(pl.BlockSpec((tm, N), lambda i: (i, 0)),
                   pl.BlockSpec((tm, N), lambda i: (i, 0))),
        compiler_params=pltpu.CompilerParams(
            dimension_semantics=("parallel",),
            vmem_limit_bytes=_VMEM_LIMIT),
        cost_estimate=pl.CostEstimate(flops=int(flops), transcendentals=M,
                                      bytes_accessed=bytes_accessed),
    )(a, wt, b, res, g, beta)


def ffn_residual_layernorm(x, w1t, b1, w2t, b2, g, beta, alpha, tm=256):
    """(f32, bf16) = LayerNorm(x*alpha + FFN(x)).  x: (M, d_model) f32."""
    M, D = x.shape
    F = w1t.shape[1]
    tm = _pick_tile(M, tm, 16)
    flops = 2 * M * D * F * 2
    bytes_accessed = int(x.size * 4 + (w1t.size + w2t.size) * 2
                         + (F + 3 * D) * 4 + M * D * (4 + 2))
    return pl.pallas_call(
        functools.partial(_ffn_res_ln_kernel, alpha=alpha),
        out_shape=(jax.ShapeDtypeStruct((M, D), jnp.float32),
                   jax.ShapeDtypeStruct((M, D), jnp.bfloat16)),
        grid=(M // tm,),
        in_specs=[
            pl.BlockSpec((tm, D), lambda i: (i, 0)),
            _spec((D, F), lambda i: (0, 0), buffers=1),     # grid-invariant
            _spec((1, F), lambda i: (0, 0), buffers=1),
            _spec((F, D), lambda i: (0, 0), buffers=1),
            _spec((1, D), lambda i: (0, 0), buffers=1),
            _spec((1, D), lambda i: (0, 0), buffers=1),
            _spec((1, D), lambda i: (0, 0), buffers=1),
        ],
        out_specs=(pl.BlockSpec((tm, D), lambda i: (i, 0)),
                   pl.BlockSpec((tm, D), lambda i: (i, 0))),
        compiler_params=pltpu.CompilerParams(
            dimension_semantics=("parallel",),
            vmem_limit_bytes=_VMEM_LIMIT),
        cost_estimate=pl.CostEstimate(flops=int(flops), transcendentals=M,
                                      bytes_accessed=bytes_accessed),
    )(x, w1t, b1, w2t, b2, g, beta)


def attention(q_src, k_src, v_src, q_idx, k_idx, v_idx, pad_mask, n_head,
              causal, tq=256):
    """q_src: (Gq,B,Lq,d) bf16; k_src/v_src: (Gk,B,Lk,d) bf16 (may alias q_src);
    q_idx/k_idx/v_idx select the leading-axis slab (so the fused QKV / KV
    projection buffers are consumed directly, no wrapper split copies).
    pad_mask: (B,1,Lk) int32.  Returns (B, Lq, d) bf16 heads-concatenated."""
    _, B, Lq, d_model = q_src.shape
    Lk = k_src.shape[2]
    tq = _pick_tile(Lq, tq, 16)
    dk = d_model // n_head
    # TODO(synk): for very long Lk switch to online-softmax (flash) with an Lk
    #             grid axis; also consider pl.Buffered(1) on K/V for v7x VMEM.
    kernel = functools.partial(_attn_kernel, n_head=n_head,
                               scale=1.0 / math.sqrt(dk), causal=causal)
    flops = 4 * B * Lq * Lk * d_model
    trans = B * n_head * Lq * Lk
    bytes_accessed = int(2 * (2 * B * Lq * d_model + 2 * B * Lk * d_model)
                         + 4 * B * Lk)
    return pl.pallas_call(
        kernel,
        out_shape=jax.ShapeDtypeStruct((B, Lq, d_model), jnp.bfloat16),
        grid=(B, Lq // tq),
        in_specs=[
            pl.BlockSpec((1, 1, tq, d_model), lambda b, qi: (q_idx, b, qi, 0)),
            pl.BlockSpec((1, 1, Lk, d_model), lambda b, qi: (k_idx, b, 0, 0)),
            pl.BlockSpec((1, 1, Lk, d_model), lambda b, qi: (v_idx, b, 0, 0)),
            pl.BlockSpec((1, 1, Lk), lambda b, qi: (b, 0, 0)),
        ],
        out_specs=pl.BlockSpec((1, tq, d_model), lambda b, qi: (b, qi, 0)),
        compiler_params=pltpu.CompilerParams(
            dimension_semantics=("parallel", "parallel"),
            vmem_limit_bytes=_VMEM_LIMIT),
        cost_estimate=pl.CostEstimate(flops=int(flops), transcendentals=int(trans),
                                      bytes_accessed=bytes_accessed),
    )(q_src, k_src, v_src, pad_mask)


# ---------------------------------------------------------------------------
# Parameter construction (deterministic, synthetic; pre-transposed, bf16)
# ---------------------------------------------------------------------------
def _xavier(key, d_out, d_in):
    lim = math.sqrt(6.0 / (d_in + d_out))
    return jax.random.uniform(key, (d_out, d_in), minval=-lim, maxval=lim,
                              dtype=jnp.float32)


def _init_self_attn(key, d_model):
    ks = jax.random.split(key, 4)
    wq, wk, wv, wo = (_xavier(ks[i], d_model, d_model) for i in range(4))
    return {
        "wqkv": jnp.stack([wq.T, wk.T, wv.T], axis=0).astype(jnp.bfloat16),
        "bqkv": jnp.zeros((3, 1, d_model), jnp.float32),
        "wo_t": wo.T.astype(jnp.bfloat16),
        "bo": jnp.zeros((1, d_model), jnp.float32),
    }


def _init_cross_attn(key, d_model):
    ks = jax.random.split(key, 4)
    wq, wk, wv, wo = (_xavier(ks[i], d_model, d_model) for i in range(4))
    return {
        "wq": wq.T[None].astype(jnp.bfloat16),
        "bq": jnp.zeros((1, 1, d_model), jnp.float32),
        "wkv": jnp.stack([wk.T, wv.T], axis=0).astype(jnp.bfloat16),
        "bkv": jnp.zeros((2, 1, d_model), jnp.float32),
        "wo_t": wo.T.astype(jnp.bfloat16),
        "bo": jnp.zeros((1, d_model), jnp.float32),
    }


def _init_ffn(key, d_model, d_ff):
    k1, k2 = jax.random.split(key)
    return {
        "w1_t": _xavier(k1, d_ff, d_model).T.astype(jnp.bfloat16),
        "b1": jnp.zeros((1, d_ff), jnp.float32),
        "w2_t": _xavier(k2, d_model, d_ff).T.astype(jnp.bfloat16),
        "b2": jnp.zeros((1, d_model), jnp.float32),
    }


def _pos_encode(max_seq_len, d_model):
    pos = jnp.arange(max_seq_len, dtype=jnp.float32)[:, None]
    i = jnp.arange(d_model)[None, :]
    angle = pos / jnp.power(10000.0, (2.0 * (i // 2)) / d_model)
    return jnp.where(i % 2 == 0, jnp.sin(angle), jnp.cos(angle)).astype(jnp.float32)


def init_params(key, cfg):
    d_model, d_ff = cfg["d_model"], cfg["d_ff"]
    keys = jax.random.split(key, 8)
    enc_embed = (jax.random.normal(keys[0], (cfg["n_src_words"], d_model),
                                   jnp.float32) * d_model ** (-0.5))
    enc_embed = enc_embed.at[cfg["src_pdx"]].set(0.0)
    dec_embed = (jax.random.normal(keys[1], (cfg["n_tgt_words"], d_model),
                                   jnp.float32) * d_model ** (-0.5))
    dec_embed = dec_embed.at[cfg["tgt_pdx"]].set(0.0)

    enc_layers = []
    for lk in jax.random.split(keys[2], cfg["n_encoder_layers"]):
        k1, k2 = jax.random.split(lk)
        enc_layers.append({
            "ln1_g": jnp.ones((1, d_model), jnp.float32),
            "ln1_b": jnp.zeros((1, d_model), jnp.float32),
            "attn": _init_self_attn(k1, d_model),
            "ln2_g": jnp.ones((1, d_model), jnp.float32),
            "ln2_b": jnp.zeros((1, d_model), jnp.float32),
            "ffn": _init_ffn(k2, d_model, d_ff),
        })

    dec_layers = []
    for lk in jax.random.split(keys[3], cfg["n_decoder_layers"]):
        k1, k2, k3 = jax.random.split(lk, 3)
        dec_layers.append({
            "ln1_g": jnp.ones((1, d_model), jnp.float32),
            "ln1_b": jnp.zeros((1, d_model), jnp.float32),
            "self_attn": _init_self_attn(k1, d_model),
            "ln2_g": jnp.ones((1, d_model), jnp.float32),
            "ln2_b": jnp.zeros((1, d_model), jnp.float32),
            "cross_attn": _init_cross_attn(k2, d_model),
            "ln3_g": jnp.ones((1, d_model), jnp.float32),
            "ln3_b": jnp.zeros((1, d_model), jnp.float32),
            "ffn": _init_ffn(k3, d_model, d_ff),
        })

    # Vocab projection, padded to a 128-lane multiple so tiling never falls
    # back to one huge block.  TODO(synk): on v7x this weight could be fp8.
    V = cfg["n_tgt_words"]
    Vp = ((V + 127) // 128) * 128
    w_out = jnp.zeros((d_model, Vp), jnp.float32).at[:, :V].set(
        _xavier(keys[4], V, d_model).T)

    return {
        "enc_embed": enc_embed,
        "dec_embed": dec_embed,
        "pos_encode": _pos_encode(cfg["max_seq_len"], d_model),
        "encoder_layers": enc_layers,
        "decoder_layers": dec_layers,
        "out_proj_w": w_out[None].astype(jnp.bfloat16),      # (1, d, Vp)
        "out_proj_b": jnp.zeros((1, 1, Vp), jnp.float32),
    }


# ---------------------------------------------------------------------------
# Full forward pass (post-norm encoder/decoder, eval-mode dropout)
# ---------------------------------------------------------------------------
def transformer_forward(params, src_tokens, prev_tgt_tokens, cfg):
    d_model, n_head = cfg["d_model"], cfg["n_head"]
    B, S = src_tokens.shape
    T = prev_tgt_tokens.shape[1]
    V = cfg["n_tgt_words"]

    src_pad = (src_tokens == cfg["src_pdx"]).astype(jnp.int32).reshape(B, 1, S)
    tgt_pad = (prev_tgt_tokens == cfg["tgt_pdx"]).astype(jnp.int32).reshape(B, 1, T)

    # DeepNet-style alphas, reproducing the original _model_init exactly
    # (decoder_alpha is assigned to the encoder object => decoder stays 1.0).
    N, M = cfg["n_encoder_layers"], cfg["n_decoder_layers"]
    encoder_alpha = 0.81 * (N ** 4 * M) ** (1.0 / 16.0)
    decoder_alpha = 1.0

    # TODO(synk): dropout is treated as identity (eval-mode forward).
    # TODO(synk): embedding gather + positional add left to XLA (tiny).

    # --------------------------- Encoder ---------------------------
    x = jnp.take(params["enc_embed"], src_tokens, axis=0) * math.sqrt(d_model)
    x = x + params["pos_encode"][:S][None]
    x2d = x.reshape(B * S, d_model)                 # f32 residual stream
    x2d_bf = x2d.astype(jnp.bfloat16)               # bf16 matmul activations
    for lp in params["encoder_layers"]:
        ap = lp["attn"]
        qkv = grouped_matmul_bias(x2d_bf, ap["wqkv"], ap["bqkv"])
        qkv = qkv.reshape(3, B, S, d_model)
        attn = attention(qkv, qkv, qkv, 0, 1, 2, src_pad, n_head, causal=False)
        x2d, x2d_bf = proj_residual_layernorm(
            attn.reshape(B * S, d_model), ap["wo_t"], ap["bo"],
            x2d, lp["ln1_g"], lp["ln1_b"], encoder_alpha)
        fp = lp["ffn"]
        x2d, x2d_bf = ffn_residual_layernorm(
            x2d, fp["w1_t"], fp["b1"], fp["w2_t"], fp["b2"],
            lp["ln2_g"], lp["ln2_b"], encoder_alpha)
    memory_bf = x2d_bf                               # feeds cross-attn KV proj

    # --------------------------- Decoder ---------------------------
    y = jnp.take(params["dec_embed"], prev_tgt_tokens, axis=0) * math.sqrt(d_model)
    y = y + params["pos_encode"][:T][None]
    y2d = y.reshape(B * T, d_model)
    y2d_bf = y2d.astype(jnp.bfloat16)
    for lp in params["decoder_layers"]:
        sp = lp["self_attn"]
        qkv = grouped_matmul_bias(y2d_bf, sp["wqkv"], sp["bqkv"])
        qkv = qkv.reshape(3, B, T, d_model)
        attn = attention(qkv, qkv, qkv, 0, 1, 2, tgt_pad, n_head, causal=True)
        y2d, y2d_bf = proj_residual_layernorm(
            attn.reshape(B * T, d_model), sp["wo_t"], sp["bo"],
            y2d, lp["ln1_g"], lp["ln1_b"], decoder_alpha)

        cp = lp["cross_attn"]
        qc = grouped_matmul_bias(y2d_bf, cp["wq"], cp["bq"]).reshape(1, B, T, d_model)
        kvc = grouped_matmul_bias(memory_bf, cp["wkv"], cp["bkv"]).reshape(2, B, S, d_model)
        attn = attention(qc, kvc, kvc, 0, 0, 1, src_pad, n_head, causal=False)
        y2d, y2d_bf = proj_residual_layernorm(
            attn.reshape(B * T, d_model), cp["wo_t"], cp["bo"],
            y2d, lp["ln2_g"], lp["ln2_b"], decoder_alpha)

        fp = lp["ffn"]
        y2d, y2d_bf = ffn_residual_layernorm(
            y2d, fp["w1_t"], fp["b1"], fp["w2_t"], fp["b2"],
            lp["ln3_g"], lp["ln3_b"], decoder_alpha)

    # Vocab projection: keep the small (B*T, d_model) activation fully
    # resident (tm >= M) so the kernel is a pure weight stream over (N, K).
    logits = grouped_matmul_bias(y2d_bf, params["out_proj_w"],
                                 params["out_proj_b"], out_dtype=jnp.float32,
                                 tm=1024, tn=512, tk=512)
    Vp = logits.shape[-1]
    return logits.reshape(B, T, Vp)[..., :V]


# ---------------------------------------------------------------------------
if __name__ == "__main__":
    cfg = {
        "n_src_words": 50,
        "n_tgt_words": 48,
        "src_pdx": 0,
        "tgt_pdx": 0,
        "d_model": 32,
        "d_ff": 64,
        "n_head": 4,
        "n_encoder_layers": 2,
        "n_decoder_layers": 2,
        "max_seq_len": 64,
    }
    B, S, T = 2, 8, 8

    key = jax.random.PRNGKey(0)
    k_param, k_src, k_tgt = jax.random.split(key, 3)
    params = init_params(k_param, cfg)

    src_tokens = jax.random.randint(k_src, (B, S), 1, cfg["n_src_words"], dtype=jnp.int32)
    prev_tgt_tokens = jax.random.randint(k_tgt, (B, T), 1, cfg["n_tgt_words"], dtype=jnp.int32)
    # add some padding tokens so the masking path is exercised
    src_tokens = src_tokens.at[:, -2:].set(cfg["src_pdx"])
    prev_tgt_tokens = prev_tgt_tokens.at[:, -1:].set(cfg["tgt_pdx"])

    out = transformer_forward(params, src_tokens, prev_tgt_tokens, cfg)
    out = jax.block_until_ready(out)
    assert out.shape == (B, T, cfg["n_tgt_words"]), out.shape
    assert bool(jnp.all(jnp.isfinite(out)))
    print("KERNEL_OK")
</pallas_src>

<mosaic_0001>
module attributes {stable_mosaic.version = 11 : i64} {
  func.func @_copy(%arg0: i32, %arg1: memref<8x128xf32, #tpu.memory_space<vmem>>, %arg2: memref<8x128xf32, #tpu.memory_space<vmem>>) attributes {dimension_semantics = [#tpu.dimension_semantics<arbitrary>], iteration_bounds = array<i64: 2>, scalar_prefetch = 0 : i64, scratch_operands = 0 : i64, tpu.core_type = #tpu.core_type<tc>, window_params = [{pipeline_mode = #tpu.pipeline_mode<synchronous>, transform_indices = @transform_0, window_bounds = array<i64: 8, 128>}, {transform_indices = @transform_1, window_bounds = array<i64: 8, 128>}]} {
    %c0 = arith.constant 0 : index
    %c0_0 = arith.constant 0 : index
    %0 = vector.load %arg1[%c0, %c0_0] : memref<8x128xf32, #tpu.memory_space<vmem>>, vector<8x128xf32>
    %c0_1 = arith.constant 0 : index
    %c0_2 = arith.constant 0 : index
    %1 = vector.load %arg2[%c0_1, %c0_2] : memref<8x128xf32, #tpu.memory_space<vmem>>, vector<8x128xf32>
    tpu.vector_store %arg2[%c0_1, %c0_2], %0 {strides = array<i32>} : memref<8x128xf32, #tpu.memory_space<vmem>>, vector<8x128xf32>,
    return
  }
  func.func @transform_0(%arg0: i32) -> (i32, i32) {
    %c0_i32 = arith.constant 0 : i32
    %c0_i32_0 = arith.constant 0 : i32
    return %arg0, %c0_i32 : i32, i32
  }
  func.func @transform_1(%arg0: i32) -> (i32, i32) {
    %c0_i32 = arith.constant 0 : i32
    %c0_i32_0 = arith.constant 0 : i32
    return %arg0, %c0_i32 : i32, i32
  }
}

module attributes {stable_mosaic.version = 11 : i64} {
  func.func @_matmul_bias_kernel(%arg0: i32, %arg1: i32, %arg2: i32, %arg3: i32, %arg4: memref<16x32xbf16, #tpu.memory_space<vmem>>, %arg5: memref<1x32x32xbf16, #tpu.memory_space<vmem>>, %arg6: memref<1x1x32xf32, #tpu.memory_space<vmem>>, %arg7: memref<1x16x32xbf16, #tpu.memory_space<vmem>>, %arg8: memref<16x32xf32, #tpu.memory_space<vmem>>) attributes {dimension_semantics = [#tpu.dimension_semantics<parallel>, #tpu.dimension_semantics<parallel>, #tpu.dimension_semantics<parallel>, #tpu.dimension_semantics<arbitrary>], iteration_bounds = array<i64: 1, 3, 1, 1>, scalar_prefetch = 0 : i64, scratch_operands = 1 : i64, tpu.core_type = #tpu.core_type<tc>, window_params = [{transform_indices = @transform_0, window_bounds = array<i64: 16, 32>}, {transform_indices = @transform_1, window_bounds = array<i64: 1, 32, 32>}, {transform_indices = @transform_2, window_bounds = array<i64: 1, 1, 32>}, {transform_indices = @transform_3, window_bounds = array<i64: 1, 16, 32>}]} {
    %c0_i32 = arith.constant 0 : i32
    %0 = arith.cmpi eq, %arg3, %c0_i32 : i32
    %1 = arith.extui %0 : i1 to i32
    %c0_i32_0 = arith.constant 0 : i32
    %2 = arith.cmpi ne, %1, %c0_i32_0 : i32
    scf.if %2 {
      %cst_11 = arith.constant 0.000000e+00 : f32
      %13 = vector.broadcast %cst_11 : f32 to vector<16x32xf32>
      %c0_12 = arith.constant 0 : index
      %c0_13 = arith.constant 0 : index
      %14 = vector.load %arg8[%c0_12, %c0_13] : memref<16x32xf32, #tpu.memory_space<vmem>>, vector<16x32xf32>
      tpu.vector_store %arg8[%c0_12, %c0_13], %13 {strides = array<i32>} : memref<16x32xf32, #tpu.memory_space<vmem>>, vector<16x32xf32>,
    } else {
    }
    %c0 = arith.constant 0 : index
    %c0_1 = arith.constant 0 : index
    %3 = vector.load %arg8[%c0, %c0_1] : memref<16x32xf32, #tpu.memory_space<vmem>>, vector<16x32xf32>
    %c0_2 = arith.constant 0 : index
    %c0_3 = arith.constant 0 : index
    %4 = vector.load %arg4[%c0_2, %c0_3] : memref<16x32xbf16, #tpu.memory_space<vmem>>, vector<16x32xbf16>
    %c0_4 = arith.constant 0 : index
    %c0_5 = arith.constant 0 : index
    %c0_6 = arith.constant 0 : index
    %5 = vector.load %arg5[%c0_4, %c0_5, %c0_6] : memref<1x32x32xbf16, #tpu.memory_space<vmem>>, vector<1x32x32xbf16>
    %6 = vector.shape_cast %5 : vector<1x32x32xbf16> to vector<32x32xbf16>
    %cst = arith.constant dense<0.000000e+00> : vector<16x32xf32>
    %7 = tpu.matmul %4, %6, %cst {dimension_numbers = #tpu.dot_dimension_numbers<[1], [0], [0], [1], [0, 0, 1, 1], [], []>} : vector<16x32xbf16>, vector<32x32xbf16>, vector<16x32xf32> -> vector<16x32xf32>
    %8 = arith.addf %3, %7 : vector<16x32xf32>
    %c0_7 = arith.constant 0 : index
    %c0_8 = arith.constant 0 : index
    %9 = vector.load %arg8[%c0_7, %c0_8] : memref<16x32xf32, #tpu.memory_space<vmem>>, vector<16x32xf32>
    tpu.vector_store %arg8[%c0_7, %c0_8], %8 {strides = array<i32>} : memref<16x32xf32, #tpu.memory_space<vmem>>, vector<16x32xf32>,
    %c0_i32_9 = arith.constant 0 : i32
    %10 = arith.cmpi eq, %arg3, %c0_i32_9 : i32
    %11 = arith.extui %10 : i1 to i32
    %c0_i32_10 = arith.constant 0 : i32
    %12 = arith.cmpi ne, %11, %c0_i32_10 : i32
    scf.if %12 {
      %c0_11 = arith.constant 0 : index
      %c0_12 = arith.constant 0 : index
      %13 = vector.load %arg8[%c0_11, %c0_12] : memref<16x32xf32, #tpu.memory_space<vmem>>, vector<16x32xf32>
      %c0_13 = arith.constant 0 : index
      %c0_14 = arith.constant 0 : index
      %c0_15 = arith.constant 0 : index
      %14 = vector.load %arg6[%c0_13, %c0_14, %c0_15] : memref<1x1x32xf32, #tpu.memory_space<vmem>>, vector<1x1x32xf32>
      %15 = vector.shape_cast %14 : vector<1x1x32xf32> to vector<1x32xf32>
      %16 = vector.broadcast %15 : vector<1x32xf32> to vector<16x32xf32>
      %17 = arith.addf %13, %16 : vector<16x32xf32>
      %18 = arith.truncf %17 : vector<16x32xf32> to vector<16x32xbf16>
      %c0_16 = arith.constant 0 : index
      %c0_17 = arith.constant 0 : index
      %c0_18 = arith.constant 0 : index
      %19 = vector.load %arg7[%c0_16, %c0_17, %c0_18] : memref<1x16x32xbf16, #tpu.memory_space<vmem>>, vector<1x16x32xbf16>
      %20 = vector.shape_cast %19 : vector<1x16x32xbf16> to vector<16x32xbf16>
      %21 = vector.shape_cast %18 : vector<16x32xbf16> to vector<1x16x32xbf16>
      tpu.vector_store %arg7[%c0_16, %c0_17, %c0_18], %21 {strides = array<i32>} : memref<1x16x32xbf16, #tpu.memory_space<vmem>>, vector<1x16x32xbf16>,
    } else {
    }
    return
  }
  func.func @transform_0(%arg0: i32, %arg1: i32, %arg2: i32, %arg3: i32) -> (i32, i32) {
    %c0_i32 = arith.constant 0 : i32
    return %arg0, %arg3 : i32, i32
  }
  func.func @transform_1(%arg0: i32, %arg1: i32, %arg2: i32, %arg3: i32) -> (i32, i32, i32) {
    %c0_i32 = arith.constant 0 : i32
    return %arg1, %arg3, %arg2 : i32, i32, i32
  }
  func.func @transform_2(%arg0: i32, %arg1: i32, %arg2: i32, %arg3: i32) -> (i32, i32, i32) {
    %c0_i32 = arith.constant 0 : i32
    %c0_i32_0 = arith.constant 0 : i32
    return %arg1, %c0_i32, %arg2 : i32, i32, i32
  }
  func.func @transform_3(%arg0: i32, %arg1: i32, %arg2: i32, %arg3: i32) -> (i32, i32, i32) {
    %c0_i32 = arith.constant 0 : i32
    return %arg1, %arg0, %arg2 : i32, i32, i32
  }
}

</mosaic_0001>

<bundles_post_ra>
// kernel: tpu_custom_call.1
= control target key start
LH: loop header
LB: loop body
LE: loop exit
PB: predicated region body
PF: predicated region fallthrough
CT: control target
= control target key end

     0   :  { %6 = vsyncpa [#allocation3], 0  ;;  %s480_s0 = inlined_call_operand.hbm [shape: f32[16,128], index: 0, kind: input, shape index: {}]   ;;  %s481_s1 = inlined_call_operand.hbm [shape: f32[16,128], index: 1, kind: output, shape index: {}]  }
   0x1   :  { %7 = vsyncpa [#allocation4], 0 }
   0x2   :  { %9 = vsyncpa [#allocation4 + $0x1], 0  ;;  %s360_s6 = smov 0   ;;  %s362_s7 = smov 0  }
   0x3   :  { %s364_s8 = smov 0   ;;  %s366_s9 = smov 0  }
   0x4 LB: > { %s381_s10 = sadd.s32 4294967295, %s347_s9   ;;  %s196_s11 = sadd.s32 4294967294, %s347_s9   ;;  %s347_s9 = sphi %s366_s9, %s490_s9   ;;  %s343_s8 = sphi %s364_s8, %s489_s8   ;;  %s339_s7 = sphi %s362_s7, %s488_s7   ;;  %s335_s6 = sphi %s360_s6, %s487_s6  }
   0x5   : > { %s385_s12 = sadd.s32 1, %s347_s9   ;;  %s22_s13 = sadd.s32 1, %s343_s8 }
   0x6   : > { %s19_s14 = ssub.s32 %s347_s9, %s385_s12  ;;  %p35_p0 = scmp.ne.s32.totalorder %s339_s7, %s335_s6 }
   0x7   : > { %p20_p1 = scmp.eq.s32.totalorder %s19_s14, 0  ;;  %p36_p2 = scmp.eq.s32.totalorder %s381_s10, 0 }
   0x8   : > { %p58_p3 = scmp.ne.s32.totalorder %s343_s8, %s339_s7  ;;  %p59_p4 = scmp.eq.s32.totalorder %s381_s10, 1 }
   0x9   : > { %s397_s15 = scalar_select %p20_p1, %s343_s8, %s22_s13  }
   0xa   : > { %p399_p5 = por %p36_p2, %p35_p0  ;;  %p403_p6 = por %p59_p4, %p58_p3 }
   0xb   : > { %p65_p7 = scmp.eq.s32.totalorder %s196_s11, 1  ;;  %p197_p8 = scmp.ge.s32.totalorder %s347_s9, 1 }
   0xc   : > { %p72_p9 = scmp.lt.s32.totalorder %s347_s9, 3  ;;  %s198_s18 = sshll.u32 %s381_s10, 3 }
   0xd   : > { %p410_p10 = por %p65_p7, %p35_p0  ;;  %s84_s22 = scalar_lea.hbm %s480_s0, %s198_s18 }
   0xe   : > { %p419_p11 = pnand %p197_p8, %p72_p9  ;;  %s86_s24 = sshll.u32 %s84_s22, 4  ;;  %s87_s24 = int_to_ptr.hbm [resolvable:$true] %s86_s24 }
   0xf   : > { %s349_s25 = smov [#allocation2]   ;;  %s251_s28 = sshra.s32 %s87_s24, 4  ;;  %s252_s28 = int_to_ptr.hbm [resolvable:$true] %s251_s28 }
  0x10   : > { %p209_p12 = pneg %p419_p11  ;;  %s88_s26 = sshll.u32 %s349_s25, 4  ;;  %s89_s26 = int_to_ptr.vmem [resolvable:$true] %s88_s26 }
  0x11   : > { %s253_s29 = scalar_lea.hbm %s252_s28, 8  ;;  %s258_s3 = scalar_lea.hbm %s480_s0, 16 }
  0x12   : > { %p427_p13 = pnand %p209_p12, %p399_p5  ;;  %p254_p0 = scmp.ne.s32.totalorder %s252_s28, %s253_s29 }
  0x13   : > { %p259_p4 = scmp.lt.s32.totalorder %s252_s28, %s480_s0  ;;  %p260_p7 = scmp.lt.s32.totalorder %s258_s3, %s253_s29 }
  0x14   : > { %p255_p1 = pneg %p427_p13 }
  0x15   : > { %p261_p8 = por %p260_p7, %p259_p4 }
  0x16   : > { %p256_p2 = pnand %p255_p1, %p254_p0 }
  0x18   : > { %p257_p3 = pneg %p256_p2 }
  0x1a   : > { %p262_p9 = pnand %p261_p8, %p257_p3 }
  0x1c   : > { %265 = shalt.err (!%p262_p9)
}
  0x1d   : > { %212 = dma.hbm_to_vmem [thread:$0]  (!%p427_p13), %s87_s24, 128, %s89_s26, [#allocation3]  }
  0x1e   : > { %101 = sbr.rel (%p419_p11) target bundleno = 51 (0x33), region = 24 }
  0x23   : > { %326 = dma.done.wait (%p399_p5), [#allocation3], 128  }
  0x24   : > { %328 = vsyncadd (%p399_p5), [#allocation3], 4294967168  ;;  %s114_s11 = sand.u32 1, %s339_s7   ;;  %s130_s20 = scalar_lea.hbm %s481_s1, %s198_s18  ;;  %v117_v0 = vld [vmem:[#allocation2] sm:$0xff] }
  0x25   : > { %s200_s21 = sshll.u32 %s114_s11, 3  ;;  %s134_s23 = sshll.u32 %s130_s20, 4  ;;  %s135_s23 = int_to_ptr.hbm [resolvable:$true] %s134_s23 }
  0x26   : > { %s116_s22 = scalar_lea.vmem [#allocation5], %s200_s21  ;;  %s120_s25 = scalar_lea.sflag [#allocation4], %s114_s11 }
  0x27   : > { %s132_s24 = sshll.u32 %s116_s22, 4  ;;  %118 = vst [vmem:[%s116_s22] sm:$0xff] %v117_v0  ;;  %s295_s16 = sshra.s32 %s135_s23, 4  ;;  %s133_s24 = int_to_ptr.vmem [resolvable:$true] %s132_s24  ;;  %s296_s16 = int_to_ptr.hbm [resolvable:$true] %s295_s16 }
  0x28   : > { %s297_s26 = scalar_lea.hbm %s296_s16, 8  ;;  %s301_s18 = scalar_lea.hbm %s481_s1, 16 }
  0x29   : > { %p298_p5 = scmp.ne.s32.totalorder %s296_s16, %s297_s26  ;;  %p302_p13 = scmp.lt.s32.totalorder %s296_s16, %s481_s1 }
  0x2a   : > { %p303_p0 = scmp.lt.s32.totalorder %s301_s18, %s297_s26 }
  0x2b   : > { %p299_p11 = pnand %p298_p5, %p403_p6 }
  0x2c   : > { %p304_p1 = por %p303_p0, %p302_p13 }
  0x2d   : > { %p300_p12 = pneg %p299_p11 }
  0x2f   : > { %p305_p2 = pnand %p304_p1, %p300_p12 }
  0x31   : > { %308 = shalt.err (!%p305_p2)
}
  0x32   : > { %207 = dma.vmem_to_hbm [thread:$0]  (%p403_p6), %s133_s24, 128, %s135_s23, %s120_s25  }
  0x33 PF: > { %p217_p3 = scmp.ge.s32.totalorder %s347_s9, 2  ;;  %s146_s30 = sand.u32 1, %s335_s6  }
  0x34   : > { %s147_s2 = scalar_lea.sflag [#allocation4], %s146_s30 }
  0x35   : > { %p214_p4 = pnand %p217_p3, %p410_p10 }
  0x37   : > { %p215_p7 = pneg %p214_p4 }
  0x39   : > { %330 = dma.done.wait (%p215_p7), %s147_s2, 128  }
  0x3a   : > { %332 = vsyncadd (%p215_p7), %s147_s2, 4294967168  ;;  %p12_p8 = scmp.ge.s32.totalorder %s385_s12, 4   ;;  %s487_s6 = smov %s339_s7 }
  0x3b   : > { %s488_s7 = smov %s343_s8  ;;  %s489_s8 = smov %s397_s15 }
  0x3c   : > { %s490_s9 = smov %s385_s12  ;;  %14 = sbr.rel (!%p12_p8) target bundleno = 4 (0x4), region = 62 }
  0x41   :  { %153 = vsyncpa [#allocation3], 1 }
  0x42   :  { %155 = vsyncpa [#allocation3 + $0x1], 1 }
  0x43   :  { %156 = vsyncpa [#allocation4], 1 }
  0x44   :  { %158 = vsyncpa [#allocation4 + $0x1], 1 }

// kernel: tpu_custom_call.1
= control target key start
LH: loop header
LB: loop body
LE: loop exit
PB: predicated region body
PF: predicated region fallthrough
CT: control target
= control target key end

     0   :  { %8 = vsyncpa [#allocation4], 0  ;;  %s1016_s0 = inlined_call_operand.hbm [shape: bf16[16,32], index: 0, kind: input, shape index: {}]   ;;  %s1017_s1 = inlined_call_operand.hbm [shape: bf16[3,32,32], index: 1, kind: input, shape index: {}]   ;;  %s1018_s2 = inlined_call_operand.hbm [shape: f32[3,1,32], index: 2, kind: input, shape index: {}]   ;;  %s1019_s3 = inlined_call_operand.hbm [shape: bf16[3,16,32], index: 3, kind: output, shape index: {}]  }
   0x1   :  { %9 = vsyncpa [#allocation7], 0 }
   0x2   :  { %11 = vsyncpa [#allocation7 + $0x1], 0 }
   0x3   :  { %12 = vsyncpa [#allocation5], 0 }
   0x4   :  { %14 = vsyncpa [#allocation5 + $0x1], 0  ;;  %s835_s12 = smov 0   ;;  %s837_s13 = smov 0  }
   0x5   :  { %s839_s14 = smov 0   ;;  %s841_s15 = smov 0  }
   0x6   :  { %s843_s16 = smov 0   ;;  %s845_s17 = smov 0  }
   0x7 LB: > { %s42_s18 = sadd.s32 1, %s803_s16  ;;  %s85_s19 = sadd.s32 1, %s795_s14  ;;  %s807_s17 = sphi %s845_s17, %s20_s17   ;;  %s803_s16 = sphi %s843_s16, %s1030_s16   ;;  %s799_s15 = sphi %s841_s15, %s1029_s15   ;;  %s795_s14 = sphi %s839_s14, %s1028_s14   ;;  %s791_s13 = sphi %s837_s13, %s1027_s13   ;;  %s787_s12 = sphi %s835_s12, %s1026_s12  }
   0x8   : > { %p44_p0 = scmp.ge.s32.totalorder %s42_s18, 3  ;;  %p92_p1 = scmp.ne.s32.totalorder %s795_s14, %s791_s13 }
   0x9   : > { %p93_p2 = scmp.eq.s32.totalorder %s807_s17, 0  ;;  %p573_p5 = scmp.lt.s32.totalorder %s807_s17, 3 }
   0xa   : > { %s1032_s18 = smov (%p44_p0, %s42_s18), 0  ;;  %s198_s22 = sand.u32 1, %s807_s17  }
   0xb   : > { %p875_p3 = por %p93_p2, %p92_p1  ;;  %s78_s21 = ssub.s32 %s803_s16, %s1032_s18 }
   0xc   : > { %p83_p4 = scmp.eq.s32.totalorder %s78_s21, 0  ;;  %s200_s23 = sand.u32 1, %s795_s14  }
   0xd   : > { %s517_s25 = sshll.u32 %s200_s23, 4  ;;  %s542_s26 = sshll.u32 %s803_s16, 4 }
   0xe   : > { %s885_s24 = scalar_select %p83_p4, %s795_s14, %s85_s19  }
   0xf   : > { %s210_s29 = scalar_lea.hbm %s1017_s1, %s542_s26  ;;  %s202_s30 = scalar_lea.vmem [#allocation6], %s517_s25 }
  0x10   : > { %s213_s4 = sshll.u32 %s202_s30, 4  ;;  %s211_s5 = sshll.u32 %s210_s29, 4  ;;  %s214_s4 = int_to_ptr.vmem [resolvable:$true] %s213_s4  ;;  %s212_s5 = int_to_ptr.hbm [resolvable:$true] %s211_s5 }
  0x11   : > { %p895_p6 = pnand %p573_p5, %p875_p3  ;;  %s899_s7 = scalar_lea.sflag [#allocation7], %s198_s22 }
  0x12   : > { %s809_s8 = smov 64   ;;  %s810_s9 = smov 4  }
  0x13   : > { %564 = dma.hbm_to_vmem [thread:$0]  (!%p895_p6), %s212_s5, 256, %s214_s4, %s899_s7, %s809_s8, %s809_s8, %s810_s9  }
  0x14   : > { %s908_s10 = sadd.s32 4294967295, %s807_s17   ;;  %s513_s11 = sadd.s32 4294967294, %s807_s17  }
  0x15   : > { %p98_p7 = scmp.ne.s32.totalorder %s791_s13, %s787_s12  ;;  %p99_p8 = scmp.eq.s32.totalorder %s908_s10, 0 }
  0x16   : > { %p154_p9 = scmp.eq.s32.totalorder %s908_s10, 2  ;;  %p160_p10 = scmp.eq.s32.totalorder %s513_s11, 2 }
  0x17   : > { %p514_p11 = scmp.ge.s32.totalorder %s807_s17, 1  ;;  %p918_p12 = por %p99_p8, %p98_p7 }
  0x18   : > { %p925_p13 = por %p154_p9, %p92_p1  ;;  %p929_p0 = por %p160_p10, %p98_p7 }
  0x19   : > { %p167_p2 = scmp.lt.s32.totalorder %s807_s17, 4  ;;  %s182_s26 = sshll.u32 %s1016_s0, 4  ;;  %s183_s26 = int_to_ptr.hbm [resolvable:$true] %s182_s26 }
  0x1a   : > { %s811_s28 = smov [#allocation3]   ;;  %s230_s5 = scalar_lea.hbm %s1018_s2, %s803_s16 }
  0x1b   : > { %p937_p3 = pnand %p514_p11, %p167_p2  ;;  %s184_s29 = sshll.u32 %s811_s28, 4  ;;  %s185_s29 = int_to_ptr.vmem [resolvable:$true] %s184_s29 }
  0x1c   : > { %s232_s11 = sshll.u32 %s230_s5, 4  ;;  %s226_s22 = scalar_lea.vmem [#allocation8], %s200_s23  ;;  %s233_s11 = int_to_ptr.hbm [resolvable:$true] %s232_s11 }
  0x1d   : > { %p557_p1 = pneg %p937_p3  ;;  %s234_s25 = sshll.u32 %s226_s22, 4  ;;  %s235_s25 = int_to_ptr.vmem [resolvable:$true] %s234_s25 }
  0x1e   : > { %567 = dma.hbm_to_vmem [thread:$0]  (!%p895_p6), %s233_s11, 16, %s235_s25, %s899_s7  }
  0x1f   : > { %p558_p4 = pnand %p557_p1, %p99_p8  ;;  %243 = sbr.rel (%p937_p3) target bundleno = 201 (0xc9), region = 32 }
  0x21   : > { %560 = dma.hbm_to_vmem [thread:$0]  (!%p558_p4), %s183_s26, 128, %s185_s29, [#allocation4], %s809_s8, %s809_s8, %s810_s9  }
  0x24   : > { %774 = dma.done.wait (%p99_p8), [#allocation4], 128  }
  0x25   : > { %776 = vsyncadd (%p99_p8), [#allocation4], 4294967168  ;;  %s250_s23 = sand.u32 1, %s908_s10   ;;  %s965_s28 = sand.u32 1, %s791_s13  }
  0x26   : > { %s522_s30 = sshll.u32 %s965_s28, 4  ;;  %s251_s8 = scalar_lea.sflag [#allocation7], %s250_s23 }
  0x27   : > { %s254_s6 = scalar_lea.vmem [#allocation6], %s522_s30 }
  0x28   : > { %778 = dma.done.wait (%p918_p12), %s251_s8, 272  }
  0x29   : > { %780 = vsyncadd (%p918_p12), %s251_s8, 4294967024  ;;  %vm299_vm0 = vcmask 261120   ;;  %v812_v0 = vmov 0.0   ;;  %v545_v1 = vld [vmem:[%s254_s6 + $0x8] sm:$0xff]  ;;  %v544_v2 = vld [vmem:[%s254_s6] sm:$0xff]  ;;  %s263_s7 = scalar_lea.vmem [#allocation8], %s965_s28 }
  0x2a   : > { %300 = vst.msk [vmem:[#allocation2] sm:$0xff] %vm299_vm0, %v812_v0  ;;  %337 = vmatpush.bf16.msra.mxu0 %v545_v1  ;;  %v543_v3 = vld [vmem:[#allocation3] sm:$0xff]  ;;  %v630_v8 = vld [vmem:[%s263_s7] ss:$0 sm:$0xff]  ;;  %s523_s9 = sshll.u32 %s965_s28, 3  ;;  %s546_s10 = sshll.u32 %s799_s15, 3 }
  0x2b   : > { %301 = vst.msk [vmem:[#allocation2 + $0x8] sm:$0xff] %vm299_vm0, %v812_v0  ;;  %vm362_vm1 = vcmask 257024   ;;  %s380_s27 = scalar_lea.hbm %s1019_s3, %s546_s10  ;;  %s290_s29 = scalar_lea.vmem [#allocation9], %s523_s9 }
  0x2c   : > { %s381_s4 = sshll.u32 %s290_s29, 4  ;;  %s383_s5 = sshll.u32 %s380_s27, 4  ;;  %s382_s4 = int_to_ptr.vmem [resolvable:$true] %s381_s4  ;;  %s384_s5 = int_to_ptr.hbm [resolvable:$true] %s383_s5 }
  0x2d   : > { %s366_s11 = scalar_lea.sflag [#allocation5], %s965_s28  ;;  %s735_s22 = sshra.s32 %s384_s5, 4  ;;  %s736_s22 = int_to_ptr.hbm [resolvable:$true] %s735_s22 }
  0x2e   : > { %338 = vmatpush.bf16.msra.mxu0 %v544_v2  ;;  %s737_s15 = scalar_lea.hbm %s736_s22, 8  ;;  %s741_s30 = scalar_lea.hbm %s1019_s3, 24 }
  0x2f   : > { %p738_p5 = scmp.ne.s32.totalorder %s736_s22, %s737_s15  ;;  %p742_p8 = scmp.lt.s32.totalorder %s736_s22, %s1019_s3 }
  0x30   : > { %p743_p9 = scmp.lt.s32.totalorder %s741_s30, %s737_s15 }
  0x31   : > { %536 = vmatmul.msk.bf16.vlgmr.msra.gmra.mxu0 %vm299_vm0, %v543_v3  ;;  %v302_v4 = vld [vmem:[#allocation2] sm:$0xff]  ;;  %p739_p6 = pnand %p738_p5, %p925_p13 }
  0x32   : > { %v303_v7 = vld [vmem:[#allocation2 + $0x8] sm:$0xff]  ;;  %p744_p10 = por %p743_p9, %p742_p8 }
  0x33   : > { %p740_p7 = pneg %p739_p6 }
  0x35   : > { %p745_p11 = pnand %p744_p10, %p740_p7 }
  0xae   : > { %v340_v5 = vpop.f32.mrf.mxu0 }
  0xaf   : > { %v345_v6 = vadd.f32 %v340_v5, %v302_v4 }
  0xb1   : > { %347 = vst.msk [vmem:[#allocation2] sm:$0xff] %vm299_vm0, %v345_v6 }
  0xb6   : > { %v342_v9 = vpop.f32.mrf.mxu0 }
  0xb7   : > { %v346_v10 = vadd.f32 %v342_v9, %v303_v7 }
  0xb8   : > { %v352_v11 = vld [vmem:[#allocation2] sm:$0xff] }
  0xb9   : > { %348 = vst.msk [vmem:[#allocation2 + $0x8] sm:$0xff] %vm299_vm0, %v346_v10  ;;  %v358_v12 = vadd.f32 %v630_v8, %v352_v11 }
  0xbb   : > { %v360_v13 = vpack.c.bf16 %v358_v12, %v358_v12 }
  0xbd   : > { %363 = vst.msk [vmem:[%s290_s29] sm:$0xf] %vm362_vm1, %v360_v13 }
  0xc0   : > { %v353_v14 = vld [vmem:[#allocation2 + $0x8] sm:$0xff] }
  0xc1   : > { %v359_v15 = vadd.f32 %v630_v8, %v353_v14 }
  0xc3   : > { %v361_v16 = vpack.c.bf16 %v359_v15, %v359_v15 }
  0xc5   : > { %364 = vst.msk [vmem:[%s290_s29 + $0x4] sm:$0xf] %vm362_vm1, %v361_v16 }
  0xc6   : > { %748 = shalt.err (!%p745_p11)
}
  0xc7   : > { %s813_s28 = smov 64   ;;  %s814_s7 = smov 4  }
  0xc8   : > { %555 = dma.vmem_to_hbm [thread:$0]  (%p925_p13), %s382_s4, 128, %s384_s5, %s366_s11, %s813_s28, %s813_s28, %s814_s7  }
  0xc9 PF: > { %p575_p12 = scmp.ge.s32.totalorder %s807_s17, 2  ;;  %s398_s9 = sand.u32 1, %s787_s12  }
  0xca   : > { %s399_s10 = scalar_lea.sflag [#allocation5], %s398_s9 }
  0xcb   : > { %p569_p2 = pnand %p575_p12, %p929_p0 }
  0xcd   : > { %p570_p3 = pneg %p569_p2 }
  0xcf   : > { %782 = dma.done.wait (%p570_p3), %s399_s10, 128  }
  0xd0   : > { %784 = vsyncadd (%p570_p3), %s399_s10, 4294967168  ;;  %s20_s17 = sadd.s32 1, %s807_s17   ;;  %s1026_s12 = smov %s791_s13 }
  0xd1   : > { %p17_p1 = scmp.ge.s32.totalorder %s20_s17, 5   ;;  %s1027_s13 = smov %s795_s14 }
  0xd2   : > { %s1028_s14 = smov %s885_s24  ;;  %s1029_s15 = smov %s803_s16 }
  0xd3   : > { %s1030_s16 = smov %s1032_s18  ;;  %19 = sbr.rel (!%p17_p1) target bundleno = 7 (0x7), region = 102 }
  0xd8   :  { %405 = vsyncpa [#allocation4], 1 }
  0xd9   :  { %407 = vsyncpa [#allocation4 + $0x1], 1 }
  0xda   :  { %408 = vsyncpa [#allocation7], 1 }
  0xdb   :  { %410 = vsyncpa [#allocation7 + $0x1], 1 }
  0xdc   :  { %411 = vsyncpa [#allocation5], 1 }
  0xdd   :  { %413 = vsyncpa [#allocation5 + $0x1], 1 }

</bundles_post_ra>
